<compile_context>
chip_gen: v6e
topology: v6e:2x2x1
jax: 0.10.0
libtpu: 0.0.40
codegen_flags: <defaults>
</compile_context>

<pallas_src>
import functools

import jax
import jax.numpy as jnp
from jax import lax
from jax.experimental import pallas as pl
from jax.experimental.pallas import tpu as pltpu

LANE = 128
MAX_TB = 512          # largest batch tile (rows); footprint stays < ~2 MiB VMEM


# ---------------------------------------------------------------------------
# Pallas kernel: fused gather + (Linear -> ReLU) * num_fc -> Linear(last, 1)
# ---------------------------------------------------------------------------
def _mlp_kernel(num_fc, order, tb, x_ref, p_ref, o_ref):
    """One batch tile of the full MLP forward.

    x_ref : [tb, order] int32 indices with per-mode vocab offsets pre-added
    p_ref : [num_fc + 2, 128, 128] f32 packed parameters
              slab 0           : block-diagonal embedding matrix E
              slab 1..num_fc   : zero-padded hidden weights, stored [in, out]
              slab num_fc + 1  : row l (<num_fc) = bias_l, row num_fc = w_out,
                                 row num_fc+1 = b_out replicated across lanes
    o_ref : [8, tb] f32, sublane 0 holds the distinct per-row head outputs
    """
    idx = x_ref[...]                                          # [tb, order] int32
    col = lax.broadcasted_iota(jnp.int32, (tb, LANE), 1)      # [tb, 128]

    # Multi-hot over the concatenated vocabulary (offsets already added), built
    # as an OR of compares with one final cast.  A single MXU matmul against the
    # block-diagonal embedding matrix E realizes gather + concat exactly.
    hit = col == idx[:, 0:1]
    for i in range(1, order):
        hit = hit | (col == idx[:, i:i + 1])
    multihot = hit.astype(jnp.float32)                        # [tb, 128]

    h = jnp.dot(multihot, p_ref[0], preferred_element_type=jnp.float32)

    aux = num_fc + 1                                          # aux slab index
    for l in range(num_fc):
        w = p_ref[1 + l]                                      # [128, 128]
        b = p_ref[aux, l:l + 1, :]                            # [1, 128] (ref slice)
        h = jnp.maximum(
            jnp.dot(h, w, preferred_element_type=jnp.float32) + b, 0.0)

    # Output head (last_size -> 1), lane-dense: take 8 aux rows starting at the
    # w_out row (row 0 of this block = w_out, the rest are don't-care rows) and
    # matmul against h.T so lane j of sublane 0 holds row j's scalar output.
    w8 = p_ref[aux, num_fc:num_fc + 8, :]                     # [8, 128]
    b_out = p_ref[aux, num_fc + 1:num_fc + 2, 0:1]            # [1, 1]
    out8 = jnp.dot(w8, h.T, preferred_element_type=jnp.float32)   # [8, tb]
    o_ref[...] = out8 + b_out                                 # only sublane 0 is used


# ---------------------------------------------------------------------------
# Parameter packing: one contiguous, 128-lane-padded f32 buffer.
# ---------------------------------------------------------------------------
def _pack_params(emb_tables, fc_params, out_params):
    order = len(emb_tables)
    emb_dim = int(emb_tables[0].shape[1])
    num_fc = len(fc_params)

    dims = [int(t.shape[0]) for t in emb_tables]
    offsets, off = [], 0
    for d in dims:
        offsets.append(off)
        off += d
    # TODO(synk): if sum(dimensionality), a hidden width, or num_fc+8 exceeds
    # 128, tile the slabs (128-wide on v5e, 256-wide on v6e/v7x MXU).
    assert off <= LANE
    assert order * emb_dim <= LANE
    assert all(int(w.shape[1]) <= LANE for w, _ in fc_params)
    assert num_fc + 8 <= LANE

    # slab 0: block-diagonal embedding matrix (rows = concat vocab, cols = concat emb)
    E = jnp.zeros((LANE, LANE), jnp.float32)
    for i, t in enumerate(emb_tables):
        E = E.at[offsets[i]:offsets[i] + dims[i],
                 i * emb_dim:(i + 1) * emb_dim].set(t.astype(jnp.float32))

    slabs = [E]
    aux = jnp.zeros((LANE, LANE), jnp.float32)
    for l, (w, b) in enumerate(fc_params):
        wp = jnp.zeros((LANE, LANE), jnp.float32)
        wp = wp.at[:w.shape[0], :w.shape[1]].set(w.astype(jnp.float32))
        slabs.append(wp)
        aux = aux.at[l, :b.shape[0]].set(b.astype(jnp.float32))
    w_out, b_out = out_params
    aux = aux.at[num_fc, :w_out.shape[0]].set(
        w_out.reshape(-1).astype(jnp.float32))
    aux = aux.at[num_fc + 1, :].set(b_out.astype(jnp.float32)[0])  # replicate scalar
    slabs.append(aux)

    return jnp.stack(slabs, axis=0), jnp.asarray(offsets, jnp.int32)


def _choose_batch_tile(B):
    """Multiple-of-128 batch tile, as large as possible up to MAX_TB while
    still yielding >= 2 grid steps (v7x shards 'parallel' axes over 2 TCs)."""
    target = pl.cdiv(B, 2)
    tb = LANE * pl.cdiv(target, LANE)
    return int(max(LANE, min(MAX_TB, tb)))


# ---------------------------------------------------------------------------
# Wrapper: batch-tiled pallas_call.
# ---------------------------------------------------------------------------
def mlp_pallas_forward(x_idx, emb_tables, fc_params, out_params):
    """Forward pass matching the PyTorch MLP.forward.

    x_idx      : int   [B, order]  (one column per tensor mode)
    emb_tables : list of [dim_i, embedding_dim] f32 tables
    fc_params  : list of (W [in, out], b [out])   -- W transposed vs PyTorch
    out_params : (W [last, 1], b [1])
    Returns    : f32 [B, 1]
    """
    B, order = x_idx.shape
    assert order == len(emb_tables)
    num_fc = len(fc_params)

    params, offsets = _pack_params(emb_tables, fc_params, out_params)

    tb = _choose_batch_tile(B)
    num_tiles = pl.cdiv(B, tb)
    if num_tiles > 1 and num_tiles % 2:
        num_tiles += 1        # even step count -> balanced across v7x's two TCs
    b_pad = num_tiles * tb

    # Pre-add per-mode vocabulary offsets (one tiny XLA add on [B, order]) so
    # the kernel's multi-hot build is just compares + one cast.  Padded rows
    # are zeros (a valid column), sliced off at the end.
    x_off = x_idx.astype(jnp.int32) + offsets[None, :]
    x_pad = jnp.zeros((b_pad, order), jnp.int32).at[:B, :].set(x_off)

    out = pl.pallas_call(
        functools.partial(_mlp_kernel, num_fc, order, tb),
        out_shape=jax.ShapeDtypeStruct((num_tiles * 8, tb), jnp.float32),
        grid=(num_tiles,),
        in_specs=[
            pl.BlockSpec((tb, order), lambda i: (i, 0)),        # streamed indices
            pl.BlockSpec(params.shape, lambda i: (0, 0, 0)),    # resident params
        ],
        out_specs=pl.BlockSpec((8, tb), lambda i: (i, 0)),      # lane-dense scalars
        compiler_params=pltpu.CompilerParams(
            dimension_semantics=("parallel",),
            vmem_limit_bytes=32 * 1024 * 1024),  # ~16x headroom on every gen
    )(x_pad, params)

    # Sublane 0 of each (8, tb) tile holds the tb distinct outputs.
    res = out.reshape(num_tiles, 8, tb)[:, 0, :].reshape(b_pad)[:B]
    return res[:, None]


# ---------------------------------------------------------------------------
# Pure-JAX reference (mirrors the PyTorch forward) for a sanity check.
# ---------------------------------------------------------------------------
def mlp_reference(x_idx, emb_tables, fc_params, out_params):
    order = x_idx.shape[1]
    embs = [jnp.take(emb_tables[i], x_idx[:, i], axis=0) for i in range(order)]
    h = jnp.concatenate(embs, axis=1).astype(jnp.float32)
    for (w, b) in fc_params:
        h = jnp.maximum(h @ w + b, 0.0)
    w_out, b_out = out_params
    return h @ w_out + b_out


# ---------------------------------------------------------------------------
# Deterministic parameter construction + demo run.
# ---------------------------------------------------------------------------
if __name__ == "__main__":
    # dataset.order = 3, dataset.dimensionality = [10, 12, 14]
    # layers = [24, 32, 16]  ->  embedding_dim = 24 / 3 = 8
    order = 3
    dimensionality = [10, 12, 14]
    layers = [24, 32, 16]
    assert layers[0] % order == 0
    embedding_dim = layers[0] // order
    batch = 200  # non-multiple of 128 -> exercises padding + a 2-step parallel grid

    key = jax.random.PRNGKey(0)

    # Embedding tables (nn.Embedding default init ~ N(0, 1)).
    emb_tables = []
    for i in range(order):
        key, sub = jax.random.split(key)
        emb_tables.append(
            jax.random.normal(sub, (dimensionality[i], embedding_dim), jnp.float32))

    # Hidden Linear layers, stored as [in, out] (PyTorch uses [out, in]).
    fc_params = []
    for in_size, out_size in zip(layers[:-1], layers[1:]):
        key, kw, kb = jax.random.split(key, 3)
        bound = 1.0 / jnp.sqrt(in_size)
        w = jax.random.uniform(kw, (in_size, out_size), jnp.float32, -bound, bound)
        b = jax.random.uniform(kb, (out_size,), jnp.float32, -bound, bound)
        fc_params.append((w, b))

    # Output layer: layers[-1] -> 1.
    key, kw, kb = jax.random.split(key, 3)
    bound = 1.0 / jnp.sqrt(layers[-1])
    w_out = jax.random.uniform(kw, (layers[-1], 1), jnp.float32, -bound, bound)
    b_out = jax.random.uniform(kb, (1,), jnp.float32, -bound, bound)
    out_params = (w_out, b_out)

    # Integer index input [batch, order], one column per tensor mode.
    key, kx = jax.random.split(key)
    x_idx = jnp.stack(
        [
            jax.random.randint(jax.random.fold_in(kx, i), (batch,), 0,
                               dimensionality[i])
            for i in range(order)
        ],
        axis=1,
    ).astype(jnp.int32)

    out = mlp_pallas_forward(x_idx, emb_tables, fc_params, out_params)
    out = jax.block_until_ready(out)

    ref = mlp_reference(x_idx, emb_tables, fc_params, out_params)
    assert out.shape == (batch, 1)
    assert jnp.allclose(out, ref, atol=1e-4, rtol=1e-4), "mismatch vs JAX reference"

    print("KERNEL_OK")
</pallas_src>

<mosaic_0001>
module attributes {stable_mosaic.version = 11 : i64} {
  func.func @_mlp_kernel(%arg0: i32, %arg1: memref<128x3xi32, #tpu.memory_space<vmem>>, %arg2: memref<4x128x128xf32, #tpu.memory_space<vmem>>, %arg3: memref<8x128xf32, #tpu.memory_space<vmem>>) attributes {dimension_semantics = [#tpu.dimension_semantics<parallel>], iteration_bounds = array<i64: 2>, scalar_prefetch = 0 : i64, scratch_operands = 0 : i64, tpu.core_type = #tpu.core_type<tc>, window_params = [{transform_indices = @transform_0, window_bounds = array<i64: 128, 3>}, {pipeline_mode = #tpu.pipeline_mode<synchronous>, transform_indices = @transform_1, window_bounds = array<i64: 4, 128, 128>}, {transform_indices = @transform_2, window_bounds = array<i64: 8, 128>}]} {
    %c0 = arith.constant 0 : index
    %c0_0 = arith.constant 0 : index
    %0 = vector.load %arg1[%c0, %c0_0] : memref<128x3xi32, #tpu.memory_space<vmem>>, vector<128x3xi32>
    %1 = tpu.iota {dimensions = array<i32: 1>} : vector<128x128xi32>
    %2 = vector.extract_strided_slice %0 {offsets = [0, 0], sizes = [128, 1], strides = [1, 1]} : vector<128x3xi32> to vector<128x1xi32>
    %3 = vector.broadcast %2 : vector<128x1xi32> to vector<128x128xi32>
    %4 = arith.cmpi eq, %1, %3 : vector<128x128xi32>
    %5 = vector.extract_strided_slice %0 {offsets = [0, 1], sizes = [128, 1], strides = [1, 1]} : vector<128x3xi32> to vector<128x1xi32>
    %6 = vector.broadcast %5 : vector<128x1xi32> to vector<128x128xi32>
    %7 = arith.cmpi eq, %1, %6 : vector<128x128xi32>
    %8 = arith.ori %4, %7 : vector<128x128xi1>
    %9 = vector.extract_strided_slice %0 {offsets = [0, 2], sizes = [128, 1], strides = [1, 1]} : vector<128x3xi32> to vector<128x1xi32>
    %10 = vector.broadcast %9 : vector<128x1xi32> to vector<128x128xi32>
    %11 = arith.cmpi eq, %1, %10 : vector<128x128xi32>
    %12 = arith.ori %8, %11 : vector<128x128xi1>
    %13 = arith.extui %12 : vector<128x128xi1> to vector<128x128xi32>
    %14 = arith.sitofp %13 : vector<128x128xi32> to vector<128x128xf32>
    %c0_1 = arith.constant 0 : index
    %c0_2 = arith.constant 0 : index
    %c0_3 = arith.constant 0 : index
    %15 = vector.load %arg2[%c0_1, %c0_2, %c0_3] : memref<4x128x128xf32, #tpu.memory_space<vmem>>, vector<1x128x128xf32>
    %16 = vector.shape_cast %15 : vector<1x128x128xf32> to vector<128x128xf32>
    %cst = arith.constant dense<0.000000e+00> : vector<128x128xf32>
    %17 = tpu.matmul %14, %16, %cst {dimension_numbers = #tpu.dot_dimension_numbers<[1], [0], [0], [1], [0, 0, 1, 1], [], []>} : vector<128x128xf32>, vector<128x128xf32>, vector<128x128xf32> -> vector<128x128xf32>
    %c1 = arith.constant 1 : index
    %c0_4 = arith.constant 0 : index
    %c0_5 = arith.constant 0 : index
    %18 = vector.load %arg2[%c1, %c0_4, %c0_5] : memref<4x128x128xf32, #tpu.memory_space<vmem>>, vector<1x128x128xf32>
    %19 = vector.shape_cast %18 : vector<1x128x128xf32> to vector<128x128xf32>
    %c3 = arith.constant 3 : index
    %c0_6 = arith.constant 0 : index
    %c0_7 = arith.constant 0 : index
    %20 = vector.load %arg2[%c3, %c0_6, %c0_7] : memref<4x128x128xf32, #tpu.memory_space<vmem>>, vector<1x1x128xf32>
    %21 = vector.shape_cast %20 : vector<1x1x128xf32> to vector<1x128xf32>
    %cst_8 = arith.constant dense<0.000000e+00> : vector<128x128xf32>
    %22 = tpu.matmul %17, %19, %cst_8 {dimension_numbers = #tpu.dot_dimension_numbers<[1], [0], [0], [1], [0, 0, 1, 1], [], []>} : vector<128x128xf32>, vector<128x128xf32>, vector<128x128xf32> -> vector<128x128xf32>
    %23 = vector.broadcast %21 : vector<1x128xf32> to vector<128x128xf32>
    %24 = arith.addf %22, %23 : vector<128x128xf32>
    %cst_9 = arith.constant 0.000000e+00 : f32
    %25 = vector.broadcast %cst_9 : f32 to vector<128x128xf32>
    %26 = arith.maximumf %24, %25 : vector<128x128xf32>
    %c2 = arith.constant 2 : index
    %c0_10 = arith.constant 0 : index
    %c0_11 = arith.constant 0 : index
    %27 = vector.load %arg2[%c2, %c0_10, %c0_11] : memref<4x128x128xf32, #tpu.memory_space<vmem>>, vector<1x128x128xf32>
    %28 = vector.shape_cast %27 : vector<1x128x128xf32> to vector<128x128xf32>
    %c3_12 = arith.constant 3 : index
    %c1_13 = arith.constant 1 : index
    %c0_14 = arith.constant 0 : index
    %29 = vector.load %arg2[%c3_12, %c1_13, %c0_14] : memref<4x128x128xf32, #tpu.memory_space<vmem>>, vector<1x1x128xf32>
    %30 = vector.shape_cast %29 : vector<1x1x128xf32> to vector<1x128xf32>
    %cst_15 = arith.constant dense<0.000000e+00> : vector<128x128xf32>
    %31 = tpu.matmul %26, %28, %cst_15 {dimension_numbers = #tpu.dot_dimension_numbers<[1], [0], [0], [1], [0, 0, 1, 1], [], []>} : vector<128x128xf32>, vector<128x128xf32>, vector<128x128xf32> -> vector<128x128xf32>
    %32 = vector.broadcast %30 : vector<1x128xf32> to vector<128x128xf32>
    %33 = arith.addf %31, %32 : vector<128x128xf32>
    %cst_16 = arith.constant 0.000000e+00 : f32
    %34 = vector.broadcast %cst_16 : f32 to vector<128x128xf32>
    %35 = arith.maximumf %33, %34 : vector<128x128xf32>
    %c3_17 = arith.constant 3 : index
    %c2_18 = arith.constant 2 : index
    %c0_19 = arith.constant 0 : index
    %36 = vector.load %arg2[%c3_17, %c2_18, %c0_19] : memref<4x128x128xf32, #tpu.memory_space<vmem>>, vector<1x8x128xf32>
    %37 = vector.shape_cast %36 : vector<1x8x128xf32> to vector<8x128xf32>
    %c3_20 = arith.constant 3 : index
    %c3_21 = arith.constant 3 : index
    %c0_22 = arith.constant 0 : index
    %38 = vector.load %arg2[%c3_20, %c3_21, %c0_22] : memref<4x128x128xf32, #tpu.memory_space<vmem>>, vector<1x1x1xf32>
    %39 = vector.shape_cast %38 : vector<1x1x1xf32> to vector<1x1xf32>
    %40 = tpu.transpose %35, [1, 0] : vector<128x128xf32> -> vector<128x128xf32>
    %cst_23 = arith.constant dense<0.000000e+00> : vector<8x128xf32>
    %41 = tpu.matmul %37, %40, %cst_23 {dimension_numbers = #tpu.dot_dimension_numbers<[1], [0], [0], [1], [0, 0, 1, 1], [], []>} : vector<8x128xf32>, vector<128x128xf32>, vector<8x128xf32> -> vector<8x128xf32>
    %42 = vector.broadcast %39 : vector<1x1xf32> to vector<8x128xf32>
    %43 = arith.addf %41, %42 : vector<8x128xf32>
    %c0_24 = arith.constant 0 : index
    %c0_25 = arith.constant 0 : index
    %44 = vector.load %arg3[%c0_24, %c0_25] : memref<8x128xf32, #tpu.memory_space<vmem>>, vector<8x128xf32>
    tpu.vector_store %arg3[%c0_24, %c0_25], %43 {strides = array<i32>} : memref<8x128xf32, #tpu.memory_space<vmem>>, vector<8x128xf32>,
    return
  }
  func.func @transform_0(%arg0: i32) -> (i32, i32) {
    %c0_i32 = arith.constant 0 : i32
    %c0_i32_0 = arith.constant 0 : i32
    return %arg0, %c0_i32 : i32, i32
  }
  func.func @transform_1(%arg0: i32) -> (i32, i32, i32) {
    %c0_i32 = arith.constant 0 : i32
    %c0_i32_0 = arith.constant 0 : i32
    %c0_i32_1 = arith.constant 0 : i32
    %c0_i32_2 = arith.constant 0 : i32
    return %c0_i32, %c0_i32_0, %c0_i32_1 : i32, i32, i32
  }
  func.func @transform_2(%arg0: i32) -> (i32, i32) {
    %c0_i32 = arith.constant 0 : i32
    %c0_i32_0 = arith.constant 0 : i32
    return %arg0, %c0_i32 : i32, i32
  }
}

</mosaic_0001>

<bundles_post_ra>
// kernel: tpu_custom_call.1
= control target key start
LH: loop header
LB: loop body
LE: loop exit
PB: predicated region body
PF: predicated region fallthrough
CT: control target
= control target key end

     0   :  { %7 = vsyncpa [#allocation3], 0  ;;  %s2006_s0 = inlined_call_operand.vmem [shape: s32[256,3], index: 0, kind: input, shape index: {}]   ;;  %s2007_s1 = inlined_call_operand.hbm [shape: f32[4,128,128], index: 1, kind: input, shape index: {}]   ;;  %s2008_s2 = inlined_call_operand.hbm [shape: f32[16,128], index: 2, kind: output, shape index: {}]  }
   0x1   :  { %8 = vsyncpa [#allocation4], 0 }
   0x2   :  { %10 = vsyncpa [#allocation4 + $0x1], 0  ;;  %s1691_s9 = smov 0   ;;  %s1693_s10 = smov 0  }
   0x3   :  { %s1695_s11 = smov 0   ;;  %s1697_s12 = smov 0  }
   0x4 LB: > { %s1712_s13 = sadd.s32 4294967295, %s1664_s12   ;;  %s1123_s14 = sadd.s32 4294967294, %s1664_s12   ;;  %s1664_s12 = sphi %s1697_s12, %s2016_s12   ;;  %s1660_s11 = sphi %s1695_s11, %s2015_s11   ;;  %s1656_s10 = sphi %s1693_s10, %s2014_s10   ;;  %s1652_s9 = sphi %s1691_s9, %s2013_s9  }
   0x5   : > { %s1716_s15 = sadd.s32 1, %s1664_s12   ;;  %s70_s16 = sadd.s32 1, %s1660_s11 }
   0x6   : > { %s67_s17 = ssub.s32 %s1664_s12, %s1716_s15  ;;  %p80_p0 = scmp.ne.s32.totalorder %s1660_s11, %s1656_s10 }
   0x7   : > { %p68_p1 = scmp.eq.s32.totalorder %s67_s17, 0  ;;  %p81_p2 = scmp.eq.s32.totalorder %s1712_s13, 1 }
   0x8   : > { %p86_p3 = scmp.ne.s32.totalorder %s1656_s10, %s1652_s9  ;;  %p87_p4 = scmp.eq.s32.totalorder %s1123_s14, 1 }
   0x9   : > { %s1727_s18 = scalar_select %p68_p1, %s1660_s11, %s70_s16  }
   0xa   : > { %p1729_p5 = por %p81_p2, %p80_p0  ;;  %p1733_p6 = por %p87_p4, %p86_p3 }
   0xb   : > { %p1124_p7 = scmp.ge.s32.totalorder %s1664_s12, 1  ;;  %p94_p8 = scmp.lt.s32.totalorder %s1664_s12, 3 }
   0xc   : > { %s2010_s20 = scalar_select %p1733_p6, 1, 0 }
   0xd   : > { %p1502_p9 = scmp.eq.s32.totalorder %s1712_s13, 0  ;;  %p1740_p10 = pnand %p1124_p7, %p94_p8 }
   0xe   : > { %s1666_s22 = smov [#allocation2]  }
   0xf   : > { %s106_s23 = sshll.u32 %s1666_s22, 4  ;;  %p1494_p11 = pneg %p1740_p10  ;;  %s107_s23 = int_to_ptr.vmem [resolvable:$true] %s106_s23 }
  0x10   : > { %s1585_s24 = scalar_lea.vmem %s107_s23, 8192  ;;  %p1593_p3 = scmp.lt.s32.totalorder %s107_s23, %s107_s23 }
  0x11   : > { %p1495_p12 = pnand %p1502_p9, %p1494_p11  ;;  %p1586_p0 = scmp.ne.s32.totalorder %s107_s23, %s1585_s24 }
  0x12   : > { %p1594_p4 = scmp.lt.s32.totalorder %s1585_s24, %s1585_s24 }
  0x13   : > { %p1576_p13 = pneg %p1495_p12 }
  0x14   : > { %p1595_p6 = por %p1594_p4, %p1593_p3 }
  0x15   : > { %p1588_p1 = pnand %p1586_p0, %p1576_p13 }
  0x17   : > { %p1589_p2 = pneg %p1588_p1 }
  0x19   : > { %p1596_p7 = pnand %p1595_p6, %p1589_p2 }
  0x1b   : > { %1599 = shalt.err (!%p1596_p7)
}
  0x1c   : > { %s1667_s25 = smov 128   ;;  %s1668_s26 = smov 8  }
  0x1d   : > { %1497 = dma.hbm_to_vmem [thread:$0]  (!%p1495_p12), %s2007_s1, 8192, %s107_s23, [#allocation3], %s1667_s25, %s1667_s25, %s1668_s26  }
  0x1e   : > { %131 = sbr.rel (%p1740_p10) target bundleno = 1177 (0x499), region = 28 }
  0x23   : > { %1643 = dma.done.wait (%p1502_p9), [#allocation3], 8192  }
  0x24   : > { %1645 = vsyncadd (%p1502_p9), [#allocation3], 4294959104  ;;  %s1130_s29 = sshll.u32 %s1712_s13, 4  ;;  %v1669_v0 = vmov 0   ;;  %v1670_v3 = vmov 1   ;;  %v448_v4 = vld [vmem:[#allocation2 + $0x78] sm:$0xff]  ;;  %v175_v34 = vlaneseq }
  0x25   : > { %1548 = vset.pattern.permute.xlu1 %v1669_v0  ;;  %1546 = vset.pattern.permute.xlu0 %v1669_v0  ;;  %p154_p6 = scmp.lt.s32.totalorder %s1130_s29, 31  ;;  %v447_v5 = vld [vmem:[#allocation2 + $0x70] sm:$0xff]  ;;  %v1671_v7 = vmov 2   ;;  %v446_v8 = vld [vmem:[#allocation2 + $0x68] sm:$0xff]  ;;  %v445_v11 = vld [vmem:[#allocation2 + $0x60] sm:$0xff]  ;;  %v1672_v43 = vmov 1.0  }
  0x26   : > { %1283 = vmatprep.subr.mxu0 %v448_v4  ;;  %v444_v12 = vld [vmem:[#allocation2 + $0x58] sm:$0xff]  ;;  %v443_v14 = vld [vmem:[#allocation2 + $0x50] sm:$0xff]  ;;  %v442_v15 = vld [vmem:[#allocation2 + $0x48] sm:$0xff]  ;;  %v1845_v38 = vand.u32 127, %v175_v34  ;;  %s150_s6 = sand.u32 1, %s1656_s10   ;;  %s1167_s14 = sshll.u32 %s1712_s13, 7 }
  0x27   : > { %s2018_s29 = smov (!%p154_p6, %s1130_s29), 31  ;;  %1284 = vmatpush3.msra.mxu0 %v448_v4  ;;  %v441_v17 = vld [vmem:[#allocation2 + $0x40] sm:$0xff]  ;;  %v440_v18 = vld [vmem:[#allocation2 + $0x38] sm:$0xff]  ;;  %v439_v20 = vld [vmem:[#allocation2 + $0x30] sm:$0xff]  ;;  %s1129_s7 = sshll.u32 %s150_s6, 3 }
  0x28   : > { %s1131_s30 = sshll.u32 %s2018_s29, 3  ;;  %1285 = vmatprep.subr.mxu0 %v447_v5  ;;  %v438_v21 = vld [vmem:[#allocation2 + $0x28] sm:$0xff]  ;;  %v437_v23 = vld [vmem:[#allocation2 + $0x20] sm:$0xff]  ;;  %v436_v24 = vld [vmem:[#allocation2 + $0x18] sm:$0xff]  ;;  %s152_s16 = scalar_lea.vmem [#allocation5], %s1129_s7 }
  0x29   : > { %s1763_s5 = scalar_lea.vmem %s2006_s0, %s1131_s30  ;;  %1286 = vmatpush3.msra.mxu0 %v447_v5  ;;  %v435_v27 = vld [vmem:[#allocation2 + $0x10] sm:$0xff]  ;;  %v434_v28 = vld [vmem:[#allocation2 + $0x8] sm:$0xff]  ;;  %v433_v29 = vld [vmem:[#allocation2] sm:$0xff]  ;;  %s1052_s17 = sshll.u32 %s152_s16, 4  ;;  %s1053_s17 = int_to_ptr.vmem [resolvable:$true] %s1052_s17 }
  0x2a   : > { %v1766_v1 = vld [vmem:[%s1763_s5 + $0x8] sm:$0xff]  ;;  %v159_v2 = vld [vmem:[%s1763_s5] sm:$0xff]  ;;  %v1774_v6 = vld [vmem:[%s1763_s5 + $0x18] sm:$0xff]  ;;  %1287 = vmatprep.subr.mxu0 %v446_v8  ;;  %s1971_s23 = scalar_lea.hbm %s2008_s2, %s1167_s14  ;;  %s1039_s24 = scalar_lea.sflag [#allocation4], %s150_s6 }
  0x2b   : > { %181 = vperm.xlu1 %1548, %v1766_v1   ;;  %178 = vperm.xlu0 %1546, %v159_v2   ;;  %v1780_v9 = vld [vmem:[%s1763_s5 + $0x28] sm:$0xff]  ;;  %v161_v10 = vld [vmem:[%s1763_s5 + $0x10] sm:$0xff]  ;;  %v1786_v13 = vld [vmem:[%s1763_s5 + $0x38] sm:$0xff]  ;;  %s1600_s25 = scalar_lea.vmem %s1053_s17, 128  ;;  %s1675_s26 = smov [#allocation5]  }
  0x2c   : > { %1288 = vmatpush3.msra.mxu0 %v446_v8  ;;  %v1791_v16 = vld [vmem:[%s1763_s5 + $0x48] sm:$0xff]  ;;  %v1795_v19 = vld [vmem:[%s1763_s5 + $0x58] sm:$0xff]  ;;  %v163_v25 = vld [vmem:[%s1763_s5 + $0x20] sm:$0xff]  ;;  %p1601_p8 = scmp.ne.s32.totalorder %s1053_s17, %s1600_s25  ;;  %s1604_s13 = sshll.u32 %s1675_s26, 4  ;;  %s1605_s13 = int_to_ptr.vmem [resolvable:$false] %s1604_s13 }
  0x2d   : > { %1289 = vmatprep.subr.mxu0 %v445_v11  ;;  %v1800_v22 = vld [vmem:[%s1763_s5 + $0x68] sm:$0xff]  ;;  %v1806_v26 = vld [vmem:[%s1763_s5 + $0x78] sm:$0xff]  ;;  %v165_v30 = vld [vmem:[%s1763_s5 + $0x30] sm:$0xff]  ;;  %s1606_s27 = scalar_lea.vmem %s1605_s13, 256  ;;  %p1607_p11 = scmp.lt.s32.totalorder %s1053_s17, %s1605_s13 }
  0x2e   : > { %1290 = vmatpush3.msra.mxu0 %v445_v11  ;;  %v167_v31 = vld [vmem:[%s1763_s5 + $0x40] sm:$0xff]  ;;  %v169_v32 = vld [vmem:[%s1763_s5 + $0x50] sm:$0xff]  ;;  %v610_v47 = vld [vmem:[#allocation2 + $0xf8] sm:$0xff]  ;;  %p1602_p9 = pnand %p1601_p8, %p1729_p5  ;;  %p1608_p12 = scmp.lt.s32.totalorder %s1606_s27, %s1600_s25 }
  0x2f   : > { %1549 = vset.pattern.permute.xlu1 %v1670_v3  ;;  %1547 = vset.pattern.permute.xlu0 %v1670_v3  ;;  %v171_v33 = vld [vmem:[%s1763_s5 + $0x60] sm:$0xff]  ;;  %v173_v37 = vld [vmem:[%s1763_s5 + $0x70] sm:$0xff]  ;;  %v608_v50 = vld [vmem:[#allocation2 + $0xe8] sm:$0xff] }
  0x30   : > { %245 = vperm.xlu1 %1549, %v1766_v1   ;;  %242 = vperm.xlu0 %1547, %v159_v2   ;;  %v609_v48 = vld [vmem:[#allocation2 + $0xf0] sm:$0xff]  ;;  %v607_v52 = vld [vmem:[#allocation2 + $0xe0] sm:$0xff]  ;;  %v606_v54 = vld [vmem:[#allocation2 + $0xd8] sm:$0xff]  ;;  %p1603_p10 = pneg %p1602_p9  ;;  %p1609_p13 = por %p1608_p12, %p1607_p11 }
  0x31   : > { %1291 = vmatprep.subr.mxu0 %v444_v12  ;;  %1339 = vmatprep.subr.mxu1 %v610_v47  ;;  %v605_v56 = vld [vmem:[#allocation2 + $0xd0] sm:$0xff]  ;;  %v604_v58 = vld [vmem:[#allocation2 + $0xc8] sm:$0xff]  ;;  %v603_v60 = vld [vmem:[#allocation2 + $0xc0] sm:$0xff] }
  0x32   : > { %1292 = vmatpush3.msra.mxu0 %v444_v12  ;;  %1340 = vmatpush3.msra.mxu1 %v610_v47  ;;  %v602_v61 = vld [vmem:[#allocation2 + $0xb8] sm:$0xff]  ;;  %v599_v4 = vld [vmem:[#allocation2 + $0xa0] sm:$0xff]  ;;  %v597_v8 = vld [vmem:[#allocation2 + $0x90] sm:$0xff]  ;;  %p1610_p0 = pnand %p1609_p13, %p1603_p10 }
  0x33   : > { %1293 = vmatprep.subr.mxu0 %v443_v14  ;;  %1341 = vmatprep.subr.mxu1 %v609_v48  ;;  %v598_v5 = vld [vmem:[#allocation2 + $0x98] sm:$0xff]  ;;  %v785_v47 = vld [vmem:[#allocation2 + $0x130] sm:$0xff] }
  0x34   : > { %1550 = vset.pattern.permute.xlu1 %v1671_v7  ;;  %1553 = vset.pattern.permute.xlu0 %v1669_v0 }
  0x35   : > { %322 = vperm.xlu1 %1550, %v159_v2   ;;  %187 = vperm.xlu0 %1553, %v1774_v6  }
  0x36   : > { %1294 = vmatpush3.msra.mxu0 %v443_v14  ;;  %1342 = vmatpush3.msra.mxu1 %v609_v48  ;;  %v784_v48 = vld [vmem:[#allocation2 + $0x128] sm:$0xff] }
  0x37   : > { %1295 = vmatprep.subr.mxu0 %v442_v15  ;;  %1343 = vmatprep.subr.mxu1 %v608_v50 }
  0x38   : > { %1296 = vmatpush3.msra.mxu0 %v442_v15  ;;  %1344 = vmatpush3.msra.mxu1 %v608_v50  ;;  %v783_v50 = vld [vmem:[#allocation2 + $0x120] sm:$0xff] }
  0x39   : > { %1551 = vset.pattern.permute.xlu1 %v1669_v0  ;;  %193 = vperm.xlu0 %1553, %v1780_v9  }
  0x3a   : > { %184 = vperm.xlu1 %1551, %v161_v10   ;;  %1297 = vmatprep.subr.mxu0 %v441_v17 }
  0x3b   : > { %1298 = vmatpush3.msra.mxu0 %v441_v17  ;;  %1345 = vmatprep.subr.mxu1 %v607_v52 }
  0x3c   : > { %1299 = vmatprep.subr.mxu0 %v440_v18  ;;  %1346 = vmatpush3.msra.mxu1 %v607_v52 }
  0x3d   : > { %199 = vperm.xlu0 %1553, %v1786_v13   ;;  %1300 = vmatpush3.msra.mxu0 %v440_v18 }
  0x3e   : > { %1552 = vset.pattern.permute.xlu1 %v1670_v3  ;;  %1301 = vmatprep.subr.mxu0 %v439_v20 }
  0x3f   : > { %248 = vperm.xlu1 %1552, %v161_v10   ;;  %1302 = vmatpush3.msra.mxu0 %v439_v20 }
  0x40   : > { %1303 = vmatprep.subr.mxu0 %v438_v21  ;;  %1347 = vmatprep.subr.mxu1 %v606_v54 }
  0x41   : > { %205 = vperm.xlu0 %1553, %v1791_v16   ;;  %1304 = vmatpush3.msra.mxu0 %v438_v21 }
  0x42   : > { %1305 = vmatprep.subr.mxu0 %v437_v23  ;;  %1348 = vmatpush3.msra.mxu1 %v606_v54 }
  0x43   : > { %251 = vperm.xlu1 %1552, %v1774_v6   ;;  %1306 = vmatpush3.msra.mxu0 %v437_v23 }
  0x44   : > { %1307 = vmatprep.subr.mxu0 %v436_v24  ;;  %1349 = vmatprep.subr.mxu1 %v605_v56 }
  0x45   : > { %211 = vperm.xlu0 %1553, %v1795_v19   ;;  %1308 = vmatpush3.msra.mxu0 %v436_v24 }
  0x46   : > { %1309 = vmatprep.subr.mxu0 %v435_v27  ;;  %1350 = vmatpush3.msra.mxu1 %v605_v56 }
  0x47   : > { %1554 = vset.pattern.permute.xlu1 %v1671_v7  ;;  %1310 = vmatpush3.msra.mxu0 %v435_v27  ;;  %v595_v27 = vld [vmem:[#allocation2 + $0x80] sm:$0xff] }
  0x48   : > { %328 = vperm.xlu1 %1554, %v161_v10   ;;  %1311 = vmatprep.subr.mxu0 %v434_v28 }
  0x49   : > { %217 = vperm.xlu0 %1553, %v1800_v22   ;;  %1312 = vmatpush3.msra.mxu0 %v434_v28 }
  0x4a   : > { %1313 = vmatprep.subr.mxu0 %v433_v29  ;;  %1351 = vmatprep.subr.mxu1 %v604_v58 }
  0x4b   : > { %1314 = vmatpush3.msra.mxu0 %v433_v29  ;;  %1352 = vmatpush3.msra.mxu1 %v604_v58 }
  0x4c   : > { %1555 = vset.pattern.permute.xlu1 %v1669_v0  ;;  %1353 = vmatprep.subr.mxu1 %v603_v60 }
  0x4d   : > { %190 = vperm.xlu1 %1555, %v163_v25   ;;  %223 = vperm.xlu0 %1553, %v1806_v26  }
  0x4e   : > { %1354 = vmatpush3.msra.mxu1 %v603_v60 }
  0x4f   : > { %1355 = vmatprep.subr.mxu1 %v602_v61 }
  0x50   : > { %1356 = vmatpush3.msra.mxu1 %v602_v61  ;;  %v782_v61 = vld [vmem:[#allocation2 + $0x118] sm:$0xff] }
  0x51   : > { %1556 = vset.pattern.permute.xlu1 %v1670_v3  ;;  %1572 = vset.pattern.permute.xlu0 %v1671_v7 }
  0x52   : > { %254 = vperm.xlu1 %1556, %v163_v25   ;;  %325 = vperm.xlu0 %1572, %v1766_v1   ;;  %v600_v1 = vld [vmem:[#allocation2 + $0xa8] sm:$0xff] }
  0x56   : > { %257 = vperm.xlu1 %1556, %v1780_v9   ;;  %331 = vperm.xlu0 %1572, %v1774_v6  }
  0x5a   : > { %1557 = vset.pattern.permute.xlu1 %v1671_v7  ;;  %337 = vperm.xlu0 %1572, %v1780_v9  }
  0x5b   : > { %334 = vperm.xlu1 %1557, %v163_v25  }
  0x5e   : > { %343 = vperm.xlu0 %1572, %v1786_v13  }
  0x5f   : > { %1558 = vset.pattern.permute.xlu1 %v1669_v0 }
  0x60   : > { %196 = vperm.xlu1 %1558, %v165_v30  }
  0x62   : > { %349 = vperm.xlu0 %1572, %v1791_v16  }
  0x64   : > { %1559 = vset.pattern.permute.xlu1 %v1670_v3 }
  0x65   : > { %260 = vperm.xlu1 %1559, %v165_v30  }
  0x66   : > { %355 = vperm.xlu0 %1572, %v1795_v19  }
  0x69   : > { %263 = vperm.xlu1 %1559, %v1786_v13  }
  0x6a   : > { %361 = vperm.xlu0 %1572, %v1800_v22  }
  0x6d   : > { %1560 = vset.pattern.permute.xlu1 %v1671_v7 }
  0x6e   : > { %340 = vperm.xlu1 %1560, %v165_v30   ;;  %367 = vperm.xlu0 %1572, %v1806_v26  }
  0x72   : > { %1561 = vset.pattern.permute.xlu1 %v1669_v0 }
  0x73   : > { %202 = vperm.xlu1 %1561, %v167_v31  }
  0x77   : > { %1562 = vset.pattern.permute.xlu1 %v1670_v3 }
  0x78   : > { %266 = vperm.xlu1 %1562, %v167_v31  }
  0x7c   : > { %269 = vperm.xlu1 %1562, %v1791_v16  }
  0x80   : > { %1563 = vset.pattern.permute.xlu1 %v1671_v7 }
  0x81   : > { %346 = vperm.xlu1 %1563, %v167_v31  }
  0x85   : > { %1564 = vset.pattern.permute.xlu1 %v1669_v0 }
  0x86   : > { %208 = vperm.xlu1 %1564, %v169_v32  }
  0x8a   : > { %1565 = vset.pattern.permute.xlu1 %v1670_v3 }
  0x8b   : > { %272 = vperm.xlu1 %1565, %v169_v32  }
  0x8f   : > { %275 = vperm.xlu1 %1565, %v1795_v19  }
  0x93   : > { %1566 = vset.pattern.permute.xlu1 %v1671_v7 }
  0x94   : > { %352 = vperm.xlu1 %1566, %v169_v32  }
  0x98   : > { %1567 = vset.pattern.permute.xlu1 %v1669_v0 }
  0x99   : > { %214 = vperm.xlu1 %1567, %v171_v33  }
  0x9d   : > { %1568 = vset.pattern.permute.xlu1 %v1670_v3 }
  0x9e   : > { %278 = vperm.xlu1 %1568, %v171_v33  }
  0xa2   : > { %281 = vperm.xlu1 %1568, %v1800_v22  }
  0xa6   : > { %v1841_v35 = vpop.permute.xlu1 %181  ;;  %1569 = vset.pattern.permute.xlu1 %v1671_v7  ;;  %v179_v36 = vpop.permute.xlu0 %178 }
  0xa7   : > { %358 = vperm.xlu1 %1569, %v171_v33   ;;  %vm225_vm0 = vcmp.eq.s32.totalorder %v1845_v38, %v179_v36  ;;  %vm226_vm7 = vcmp.eq.s32.totalorder %v1845_v38, %v1841_v35 }
  0xab   : > { %v1847_v39 = vpop.permute.xlu1 %245  ;;  %1570 = vset.pattern.permute.xlu1 %v1669_v0  ;;  %v243_v40 = vpop.permute.xlu0 %242  ;;  %v601_v0 = vld [vmem:[#allocation2 + $0xb0] sm:$0xff] }
  0xac   : > { %220 = vperm.xlu1 %1570, %v173_v37   ;;  %vm289_vm1 = vcmp.eq.s32.totalorder %v1845_v38, %v243_v40  ;;  %vm290_vm5 = vcmp.eq.s32.totalorder %v1845_v38, %v1847_v39  ;;  %1357 = vmatprep.subr.mxu1 %v601_v0  ;;  %v794_v39 = vld [vmem:[#allocation2 + $0x178] sm:$0xff]  ;;  %v793_v40 = vld [vmem:[#allocation2 + $0x170] sm:$0xff] }
  0xad   : > { %vm305_vm2 = vmor %vm225_vm0, %vm289_vm1  ;;  %1358 = vmatpush3.msra.mxu1 %v601_v0  ;;  %1395 = vmatprep.subr.mxu0 %v794_v39  ;;  %v780_v0 = vld [vmem:[#allocation2 + $0x108] sm:$0xff] }
  0xae   : > { %vm306_vm8 = vmor %vm226_vm7, %vm290_vm5  ;;  %1359 = vmatprep.subr.mxu1 %v600_v1 }
  0xaf   : > { %1360 = vmatpush3.msra.mxu1 %v600_v1  ;;  %v779_v1 = vld [vmem:[#allocation2 + $0x100] sm:$0xff] }
  0xb0   : > { %1571 = vset.pattern.permute.xlu1 %v1670_v3  ;;  %v323_v41 = vpop.permute.xlu1 %322  ;;  %v1853_v42 = vpop.permute.xlu0 %187  ;;  %1361 = vmatprep.subr.mxu1 %v599_v4 }
  0xb1   : > { %vm369_vm3 = vcmp.eq.s32.totalorder %v1845_v38, %v323_v41  ;;  %284 = vperm.xlu1 %1571, %v173_v37   ;;  %vm228_vm13 = vcmp.eq.s32.totalorder %v1845_v38, %v1853_v42  ;;  %1362 = vmatpush3.msra.mxu1 %v599_v4  ;;  %v792_v41 = vld [vmem:[#allocation2 + $0x168] sm:$0xff]  ;;  %v791_v42 = vld [vmem:[#allocation2 + $0x160] sm:$0xff] }
  0xb2   : > { %vm385_vm4 = vmor %vm305_vm2, %vm369_vm3  ;;  %1363 = vmatprep.subr.mxu1 %v598_v5 }
  0xb3   : > { %1315 = vmatprep.mubr.msk.f32.mxu0 %vm385_vm4, %v1672_v43  ;;  %1364 = vmatpush3.msra.mxu1 %v598_v5 }
  0xb4   : > { %v1857_v44 = vpop.permute.xlu0 %193  ;;  %1365 = vmatprep.subr.mxu1 %v597_v8 }
  0xb5   : > { %287 = vperm.xlu1 %1571, %v1806_v26   ;;  %v185_v45 = vpop.permute.xlu1 %184  ;;  %vm230_vm4 = vcmp.eq.s32.totalorder %v1845_v38, %v1857_v44  ;;  %1366 = vmatpush3.msra.mxu1 %v597_v8  ;;  %v596_v26 = vld [vmem:[#allocation2 + $0x88] sm:$0xff]  ;;  %v790_v44 = vld [vmem:[#allocation2 + $0x158] sm:$0xff] }
  0xb6   : > { %vm227_vm9 = vcmp.eq.s32.totalorder %v1845_v38, %v185_v45  ;;  %1367 = vmatprep.subr.mxu1 %v596_v26  ;;  %v788_v45 = vld [vmem:[#allocation2 + $0x148] sm:$0xff] }
  0xb7   : > { %1368 = vmatpush3.msra.mxu1 %v596_v26 }
  0xb8   : > { %v1860_v46 = vpop.permute.xlu0 %199  ;;  %1369 = vmatprep.subr.mxu1 %v595_v27 }
  0xb9   : > { %1573 = vset.pattern.permute.xlu1 %v1671_v7  ;;  %1370 = vmatpush3.msra.mxu1 %v595_v27 }
  0xba   : > { %364 = vperm.xlu1 %1573, %v173_v37   ;;  %v249_v49 = vpop.permute.xlu1 %248 }
  0xbb   : > { %vm291_vm6 = vcmp.eq.s32.totalorder %v1845_v38, %v249_v49 }
  0xbc   : > { %v1863_v51 = vpop.permute.xlu0 %205  ;;  %vm307_vm12 = vmor %vm227_vm9, %vm291_vm6 }
  0xbe   : > { %v252_v53 = vpop.permute.xlu1 %251 }
  0xbf   : > { %vm292_vm14 = vcmp.eq.s32.totalorder %v1845_v38, %v252_v53 }
  0xc0   : > { %v1865_v55 = vpop.permute.xlu0 %211  ;;  %vm308_vm2 = vmor %vm228_vm13, %vm292_vm14  ;;  %vm232_vm14 = vcmp.eq.s32.totalorder %v1845_v38, %v1860_v46  ;;  %v786_v46 = vld [vmem:[#allocation2 + $0x138] sm:$0xff] }
  0xc3   : > { %v329_v57 = vpop.permute.xlu1 %328 }
  0xc4   : > { %v1867_v59 = vpop.permute.xlu0 %217  ;;  %vm371_vm10 = vcmp.eq.s32.totalorder %v1845_v38, %v329_v57 }
  0xc5   : > { %vm387_vm0 = vmor %vm307_vm12, %vm371_vm10 }
  0xc8   : > { %v191_v62 = vpop.permute.xlu1 %190  ;;  %v1869_v63 = vpop.permute.xlu0 %223 }
  0xc9   : > { %vm229_vm7 = vcmp.eq.s32.totalorder %v1845_v38, %v191_v62 }
  0xcd   : > { %v255_v2 = vpop.permute.xlu1 %254  ;;  %v326_v3 = vpop.permute.xlu0 %325 }
  0xce   : > { %vm370_vm11 = vcmp.eq.s32.totalorder %v1845_v38, %v326_v3  ;;  %vm293_vm3 = vcmp.eq.s32.totalorder %v1845_v38, %v255_v2 }
  0xcf   : > { %vm386_vm15 = vmor %vm306_vm8, %vm370_vm11 }
  0xd0   : > { %1316 = vmatmul.mubr.msk.f32.vlgmr.msra.gmra.mxu0 %vm386_vm15, %v1672_v43  ;;  %vm309_vm8 = vmor %vm229_vm7, %vm293_vm3 }
  0xd1   : > { %v258_v6 = vpop.permute.xlu1 %257  ;;  %v332_v7 = vpop.permute.xlu0 %331  ;;  %1318 = vmatprep.mubr.msk.f32.mxu0 %vm387_vm0, %v1672_v43  ;;  %1396 = vmatpush3.msra.mxu0 %v794_v39 }
  0xd2   : > { %vm372_vm1 = vcmp.eq.s32.totalorder %v1845_v38, %v332_v7  ;;  %vm294_vm5 = vcmp.eq.s32.totalorder %v1845_v38, %v258_v6  ;;  %1397 = vmatprep.subr.mxu0 %v793_v40  ;;  %v1164_v6 = vld [vmem:[#allocation2 + $0x180] ss:$0 sm:$0xff] }
  0xd3   : > { %vm388_vm6 = vmor %vm308_vm2, %vm372_vm1  ;;  %1398 = vmatpush3.msra.mxu0 %v793_v40 }
  0xd4   : > { %1319 = vmatmul.mubr.msk.f32.gmra.mxu0 %vm388_vm6, %v1672_v43  ;;  %vm310_vm10 = vmor %vm230_vm4, %vm294_vm5  ;;  %1399 = vmatprep.subr.mxu0 %v792_v41 }
  0xd5   : > { %v338_v9 = vpop.permute.xlu0 %337  ;;  %1400 = vmatpush3.msra.mxu0 %v792_v41 }
  0xd6   : > { %vm374_vm9 = vcmp.eq.s32.totalorder %v1845_v38, %v338_v9  ;;  %v335_v10 = vpop.permute.xlu1 %334  ;;  %1401 = vmatprep.subr.mxu0 %v791_v42 }
  0xd7   : > { %vm373_vm11 = vcmp.eq.s32.totalorder %v1845_v38, %v335_v10  ;;  %vm390_vm13 = vmor %vm310_vm10, %vm374_vm9  ;;  %1402 = vmatpush3.msra.mxu0 %v791_v42 }
  0xd8   : > { %vm389_vm12 = vmor %vm309_vm8, %vm373_vm11  ;;  %vm234_vm8 = vcmp.eq.s32.totalorder %v1845_v38, %v1863_v51  ;;  %1403 = vmatprep.subr.mxu0 %v790_v44 }
  0xd9   : > { %1321 = vmatprep.mubr.msk.f32.mxu0 %vm389_vm12, %v1672_v43  ;;  %v344_v14 = vpop.permute.xlu0 %343  ;;  %1404 = vmatpush3.msra.mxu0 %v790_v44 }
  0xda   : > { %1322 = vmatmul.mubr.msk.f32.gmra.mxu0 %vm390_vm13, %v1672_v43  ;;  %vm376_vm3 = vcmp.eq.s32.totalorder %v1845_v38, %v344_v14 }
  0xdb   : > { %v197_v11 = vpop.permute.xlu1 %196 }
  0xdc   : > { %vm231_vm1 = vcmp.eq.s32.totalorder %v1845_v38, %v197_v11 }
  0xdd   : > { %v350_v19 = vpop.permute.xlu0 %349 }
  0xde   : > { %vm378_vm13 = vcmp.eq.s32.totalorder %v1845_v38, %v350_v19 }
  0xe0   : > { %v261_v12 = vpop.permute.xlu1 %260 }
  0xe1   : > { %vm295_vm0 = vcmp.eq.s32.totalorder %v1845_v38, %v261_v12  ;;  %v356_v24 = vpop.permute.xlu0 %355 }
  0xe2   : > { %vm311_vm4 = vmor %vm231_vm1, %vm295_vm0 }
  0xe4   : > { %v264_v13 = vpop.permute.xlu1 %263 }
  0xe5   : > { %vm296_vm15 = vcmp.eq.s32.totalorder %v1845_v38, %v264_v13  ;;  %v362_v32 = vpop.permute.xlu0 %361 }
  0xe6   : > { %vm312_vm2 = vmor %vm232_vm14, %vm296_vm15 }
  0xe7   : > { %vm392_vm7 = vmor %vm312_vm2, %vm376_vm3 }
  0xe9   : > { %v341_v15 = vpop.permute.xlu1 %340  ;;  %v368_v36 = vpop.permute.xlu0 %367 }
  0xea   : > { %vm375_vm5 = vcmp.eq.s32.totalorder %v1845_v38, %v341_v15 }
  0xeb   : > { %vm391_vm6 = vmor %vm311_vm4, %vm375_vm5  ;;  %vm236_vm4 = vcmp.eq.s32.totalorder %v1845_v38, %v1865_v55 }
  0xec   : > { %1324 = vmatprep.mubr.msk.f32.mxu0 %vm391_vm6, %v1672_v43 }
  0xed   : > { %1325 = vmatmul.mubr.msk.f32.gmra.mxu0 %vm392_vm7, %v1672_v43  ;;  %vm380_vm7 = vcmp.eq.s32.totalorder %v1845_v38, %v356_v24 }
  0xee   : > { %v203_v16 = vpop.permute.xlu1 %202 }
  0xef   : > { %vm233_vm11 = vcmp.eq.s32.totalorder %v1845_v38, %v203_v16 }
  0xf3   : > { %v267_v17 = vpop.permute.xlu1 %266 }
  0xf4   : > { %vm297_vm10 = vcmp.eq.s32.totalorder %v1845_v38, %v267_v17 }
  0xf5   : > { %vm313_vm14 = vmor %vm233_vm11, %vm297_vm10 }
  0xf7   : > { %v270_v18 = vpop.permute.xlu1 %269 }
  0xf8   : > { %vm298_vm9 = vcmp.eq.s32.totalorder %v1845_v38, %v270_v18 }
  0xf9   : > { %vm314_vm12 = vmor %vm234_vm8, %vm298_vm9 }
  0xfa   : > { %vm394_vm1 = vmor %vm314_vm12, %vm378_vm13 }
  0xfc   : > { %v347_v20 = vpop.permute.xlu1 %346 }
  0xfd   : > { %vm377_vm15 = vcmp.eq.s32.totalorder %v1845_v38, %v347_v20 }
  0xfe   : > { %vm393_vm0 = vmor %vm313_vm14, %vm377_vm15  ;;  %vm238_vm14 = vcmp.eq.s32.totalorder %v1845_v38, %v1867_v59 }
  0xff   : > { %1327 = vmatprep.mubr.msk.f32.mxu0 %vm393_vm0, %v1672_v43 }
 0x100   : > { %1328 = vmatmul.mubr.msk.f32.gmra.mxu0 %vm394_vm1, %v1672_v43 }
 0x101   : > { %v209_v21 = vpop.permute.xlu1 %208 }
 0x102   : > { %vm235_vm5 = vcmp.eq.s32.totalorder %v1845_v38, %v209_v21 }
 0x106   : > { %v273_v22 = vpop.permute.xlu1 %272 }
 0x107   : > { %vm299_vm3 = vcmp.eq.s32.totalorder %v1845_v38, %v273_v22 }
 0x108   : > { %vm315_vm8 = vmor %vm235_vm5, %vm299_vm3  ;;  %vm382_vm3 = vcmp.eq.s32.totalorder %v1845_v38, %v362_v32 }
 0x10a   : > { %v276_v23 = vpop.permute.xlu1 %275 }
 0x10b   : > { %vm300_vm2 = vcmp.eq.s32.totalorder %v1845_v38, %v276_v23 }
 0x10c   : > { %vm316_vm6 = vmor %vm236_vm4, %vm300_vm2 }
 0x10d   : > { %vm396_vm11 = vmor %vm316_vm6, %vm380_vm7 }
 0x10f   : > { %v353_v25 = vpop.permute.xlu1 %352 }
 0x110   : > { %vm379_vm9 = vcmp.eq.s32.totalorder %v1845_v38, %v353_v25 }
 0x111   : > { %vm395_vm10 = vmor %vm315_vm8, %vm379_vm9  ;;  %vm240_vm8 = vcmp.eq.s32.totalorder %v1845_v38, %v1869_v63  ;;  %v781_v63 = vld [vmem:[#allocation2 + $0x110] sm:$0xff] }
 0x112   : > { %1330 = vmatprep.mubr.msk.f32.mxu0 %vm395_vm10, %v1672_v43 }
 0x113   : > { %1331 = vmatmul.mubr.msk.f32.gmra.mxu0 %vm396_vm11, %v1672_v43 }
 0x114   : > { %v215_v28 = vpop.permute.xlu1 %214 }
 0x115   : > { %vm237_vm15 = vcmp.eq.s32.totalorder %v1845_v38, %v215_v28 }
 0x119   : > { %v279_v29 = vpop.permute.xlu1 %278 }
 0x11a   : > { %vm301_vm13 = vcmp.eq.s32.totalorder %v1845_v38, %v279_v29 }
 0x11b   : > { %vm317_vm1 = vmor %vm237_vm15, %vm301_vm13  ;;  %vm384_vm13 = vcmp.eq.s32.totalorder %v1845_v38, %v368_v36 }
 0x11d   : > { %v282_v30 = vpop.permute.xlu1 %281 }
 0x11e   : > { %vm302_vm12 = vcmp.eq.s32.totalorder %v1845_v38, %v282_v30 }
 0x11f   : > { %vm318_vm0 = vmor %vm238_vm14, %vm302_vm12 }
 0x120   : > { %vm398_vm5 = vmor %vm318_vm0, %vm382_vm3  ;;  %vm1674_vm0 = vmmov 0  }
 0x122   : > { %v359_v31 = vpop.permute.xlu1 %358 }
 0x123   : > { %vm381_vm2 = vcmp.eq.s32.totalorder %v1845_v38, %v359_v31 }
 0x124   : > { %vm397_vm4 = vmor %vm317_vm1, %vm381_vm2 }
 0x125   : > { %1333 = vmatprep.mubr.msk.f32.mxu0 %vm397_vm4, %v1672_v43 }
 0x126   : > { %1334 = vmatmul.mubr.msk.f32.gmra.mxu0 %vm398_vm5, %v1672_v43 }
 0x127   : > { %v221_v33 = vpop.permute.xlu1 %220 }
 0x128   : > { %vm239_vm9 = vcmp.eq.s32.totalorder %v1845_v38, %v221_v33 }
 0x12c   : > { %v285_v34 = vpop.permute.xlu1 %284 }
 0x12d   : > { %vm303_vm7 = vcmp.eq.s32.totalorder %v1845_v38, %v285_v34 }
 0x12e   : > { %vm319_vm11 = vmor %vm239_vm9, %vm303_vm7 }
 0x130   : > { %v288_v35 = vpop.permute.xlu1 %287 }
 0x131   : > { %vm304_vm6 = vcmp.eq.s32.totalorder %v1845_v38, %v288_v35 }
 0x132   : > { %vm320_vm10 = vmor %vm240_vm8, %vm304_vm6 }
 0x133   : > { %vm400_vm15 = vmor %vm320_vm10, %vm384_vm13 }
 0x135   : > { %v365_v37 = vpop.permute.xlu1 %364 }
 0x136   : > { %vm383_vm12 = vcmp.eq.s32.totalorder %v1845_v38, %v365_v37  ;;  %v789_v38 = vld [vmem:[#allocation2 + $0x150] sm:$0xff] }
 0x137   : > { %vm399_vm14 = vmor %vm319_vm11, %vm383_vm12  ;;  %1405 = vmatprep.subr.mxu0 %v789_v38 }
 0x138   : > { %1336 = vmatprep.mubr.msk.f32.mxu0 %vm399_vm14, %v1672_v43  ;;  %1406 = vmatpush3.msra.mxu0 %v789_v38 }
 0x139   : > { %1337 = vmatmul.mubr.msk.f32.gmra.mxu0 %vm400_vm15, %v1672_v43  ;;  %v787_v43 = vld [vmem:[#allocation2 + $0x140] sm:$0xff]  ;;  %1407 = vmatprep.subr.mxu0 %v788_v45 }
 0x13a   : > { %1408 = vmatpush3.msra.mxu0 %v788_v45 }
 0x13b   : > { %1409 = vmatprep.subr.mxu0 %v787_v43 }
 0x13c   : > { %1410 = vmatpush3.msra.mxu0 %v787_v43 }
 0x13d   : > { %1411 = vmatprep.subr.mxu0 %v786_v46 }
 0x13e   : > { %1412 = vmatpush3.msra.mxu0 %v786_v46 }
 0x13f   : > { %1413 = vmatprep.subr.mxu0 %v785_v47 }
 0x140   : > { %1414 = vmatpush3.msra.mxu0 %v785_v47 }
 0x141   : > { %1415 = vmatprep.subr.mxu0 %v784_v48 }
 0x142   : > { %1416 = vmatpush3.msra.mxu0 %v784_v48 }
 0x143   : > { %1417 = vmatprep.subr.mxu0 %v783_v50 }
 0x144   : > { %1418 = vmatpush3.msra.mxu0 %v783_v50 }
 0x145   : > { %1419 = vmatprep.subr.mxu0 %v782_v61 }
 0x146   : > { %1420 = vmatpush3.msra.mxu0 %v782_v61 }
 0x147   : > { %1421 = vmatprep.subr.mxu0 %v781_v63 }
 0x148   : > { %1422 = vmatpush3.msra.mxu0 %v781_v63 }
 0x149   : > { %1423 = vmatprep.subr.mxu0 %v780_v0 }
 0x14a   : > { %1424 = vmatpush3.msra.mxu0 %v780_v0 }
 0x14b   : > { %1425 = vmatprep.subr.mxu0 %v779_v1 }
 0x14c   : > { %1426 = vmatpush3.msra.mxu0 %v779_v1 }
 0x190   : > { %v1317_v49 = vpop.f32.mrf.mxu0 }
 0x192   : > { %v515_v51 = vpop.f32.mrf.mxu0 }
 0x193   : > { %1371 = vmatprep.mubr.f32.mxu1 %v515_v51 }
 0x194   : > { %v1320_v52 = vpop.f32.mrf.mxu0  ;;  %1372 = vmatmul.mubr.f32.vlgmr.msra.gmra.mxu1 %v1317_v49 }
 0x196   : > { %v525_v53 = vpop.f32.mrf.mxu0 }
 0x197   : > { %1374 = vmatprep.mubr.f32.mxu1 %v525_v53 }
 0x198   : > { %1375 = vmatmul.mubr.f32.gmra.mxu1 %v1320_v52 }
 0x19a   : > { %v1323_v54 = vpop.f32.mrf.mxu0 }
 0x19c   : > { %v535_v55 = vpop.f32.mrf.mxu0 }
 0x19d   : > { %1377 = vmatprep.mubr.f32.mxu1 %v535_v55  ;;  %v1673_v55 = vmov 0.0  }
 0x19e   : > { %1378 = vmatmul.mubr.f32.gmra.mxu1 %v1323_v54  ;;  %1451 = vmatprep.subr.mxu1 %v1673_v55 }
 0x1ad   : > { %v1326_v56 = vpop.f32.mrf.mxu0 }
 0x1af   : > { %v545_v57 = vpop.f32.mrf.mxu0 }
 0x1b0   : > { %1380 = vmatprep.mubr.f32.mxu1 %v545_v57 }
 0x1b1   : > { %1381 = vmatmul.mubr.f32.gmra.mxu1 %v1326_v56  ;;  %v962_v56 = vld [vmem:[#allocation2 + $0x183] sm:$0x1] }
 0x1b2   : > { %1486 = vpush %v962_v56 }
 0x1c0   : > { %v1329_v58 = vpop.f32.mrf.mxu0 }
 0x1c2   : > { %v555_v59 = vpop.f32.mrf.mxu0 }
 0x1c3   : > { %1383 = vmatprep.mubr.f32.mxu1 %v555_v59 }
 0x1c4   : > { %1384 = vmatmul.mubr.f32.gmra.mxu1 %v1329_v58 }
 0x1d3   : > { %v1332_v60 = vpop.f32.mrf.mxu0 }
 0x1d5   : > { %v565_v62 = vpop.f32.mrf.mxu0 }
 0x1d6   : > { %1386 = vmatprep.mubr.f32.mxu1 %v565_v62 }
 0x1d7   : > { %1387 = vmatmul.mubr.f32.gmra.mxu1 %v1332_v60 }
 0x1e3   : > { %s1487_s8 = spop %1486 }
 0x1e6   : > { %v1335_v2 = vpop.f32.mrf.mxu0 }
 0x1e8   : > { %v575_v3 = vpop.f32.mrf.mxu0 }
 0x1e9   : > { %1389 = vmatprep.mubr.f32.mxu1 %v575_v3 }
 0x1ea   : > { %1390 = vmatmul.mubr.f32.gmra.mxu1 %v1335_v2 }
 0x1f9   : > { %v1338_v4 = vpop.f32.mrf.mxu0 }
 0x1fb   : > { %v585_v5 = vpop.f32.mrf.mxu0 }
 0x1fc   : > { %1392 = vmatprep.mubr.f32.mxu1 %v585_v5 }
 0x1fd   : > { %1393 = vmatmul.mubr.f32.gmra.mxu1 %v1338_v4 }
 0x1fe   : > { %1483 = vmatprep.mubr.msk.f32.mxu1 %vm1674_vm0, %v1673_v55 }
 0x254   : > { %v1373_v7 = vpop.f32.mrf.mxu1 }
 0x255   : > { %v689_v8 = vadd.f32 %v1373_v7, %v1164_v6  ;;  %v1165_v7 = vld [vmem:[#allocation2 + $0x181] ss:$0 sm:$0xff] }
 0x256   : > { %v683_v9 = vpop.f32.mrf.mxu1 }
 0x257   : > { %v684_v10 = vadd.f32 %v1164_v6, %v683_v9  ;;  %v763_v13 = vmax.f32 %v689_v8, 0.0 }
 0x258   : > { %v1376_v11 = vpop.f32.mrf.mxu1 }
 0x259   : > { %v762_v12 = vmax.f32 %v684_v10, 0.0  ;;  %v699_v14 = vadd.f32 %v1376_v11, %v1164_v6 }
 0x25a   : > { %v693_v15 = vpop.f32.mrf.mxu1 }
 0x25b   : > { %v694_v16 = vadd.f32 %v1164_v6, %v693_v15  ;;  %1427 = vmatprep.mubr.f32.mxu0 %v762_v12  ;;  %v765_v19 = vmax.f32 %v699_v14, 0.0 }
 0x25c   : > { %1428 = vmatmul.mubr.f32.vlgmr.msra.gmra.mxu0 %v763_v13 }
 0x25d   : > { %v764_v17 = vmax.f32 %v694_v16, 0.0 }
 0x25e   : > { %v1379_v18 = vpop.f32.mrf.mxu1 }
 0x25f   : > { %v709_v20 = vadd.f32 %v1379_v18, %v1164_v6  ;;  %1430 = vmatprep.mubr.f32.mxu0 %v764_v17 }
 0x260   : > { %v703_v21 = vpop.f32.mrf.mxu1  ;;  %1431 = vmatmul.mubr.f32.gmra.mxu0 %v765_v19 }
 0x261   : > { %v704_v22 = vadd.f32 %v1164_v6, %v703_v21  ;;  %v767_v24 = vmax.f32 %v709_v20, 0.0 }
 0x263   : > { %v766_v23 = vmax.f32 %v704_v22, 0.0 }
 0x265   : > { %1433 = vmatprep.mubr.f32.mxu0 %v766_v23 }
 0x266   : > { %1434 = vmatmul.mubr.f32.gmra.mxu0 %v767_v24 }
 0x271   : > { %v1382_v25 = vpop.f32.mrf.mxu1 }
 0x272   : > { %v719_v26 = vadd.f32 %v1382_v25, %v1164_v6 }
 0x273   : > { %v713_v27 = vpop.f32.mrf.mxu1 }
 0x274   : > { %v714_v28 = vadd.f32 %v1164_v6, %v713_v27  ;;  %v769_v30 = vmax.f32 %v719_v26, 0.0 }
 0x276   : > { %v768_v29 = vmax.f32 %v714_v28, 0.0 }
 0x278   : > { %1436 = vmatprep.mubr.f32.mxu0 %v768_v29 }
 0x279   : > { %1437 = vmatmul.mubr.f32.gmra.mxu0 %v769_v30 }
 0x284   : > { %v1385_v31 = vpop.f32.mrf.mxu1 }
 0x285   : > { %v729_v32 = vadd.f32 %v1385_v31, %v1164_v6 }
 0x286   : > { %v723_v33 = vpop.f32.mrf.mxu1 }
 0x287   : > { %v724_v34 = vadd.f32 %v1164_v6, %v723_v33  ;;  %v771_v36 = vmax.f32 %v729_v32, 0.0 }
 0x289   : > { %v770_v35 = vmax.f32 %v724_v34, 0.0 }
 0x28b   : > { %1439 = vmatprep.mubr.f32.mxu0 %v770_v35 }
 0x28c   : > { %1440 = vmatmul.mubr.f32.gmra.mxu0 %v771_v36 }
 0x297   : > { %v1388_v37 = vpop.f32.mrf.mxu1 }
 0x298   : > { %v739_v39 = vadd.f32 %v1388_v37, %v1164_v6 }
 0x299   : > { %v733_v40 = vpop.f32.mrf.mxu1 }
 0x29a   : > { %v734_v41 = vadd.f32 %v1164_v6, %v733_v40  ;;  %v773_v44 = vmax.f32 %v739_v39, 0.0 }
 0x29c   : > { %v772_v42 = vmax.f32 %v734_v41, 0.0 }
 0x29e   : > { %1442 = vmatprep.mubr.f32.mxu0 %v772_v42 }
 0x29f   : > { %1443 = vmatmul.mubr.f32.gmra.mxu0 %v773_v44  ;;  %v961_v44 = vld [vmem:[#allocation2 + $0x182] sm:$0xff] }
 0x2aa   : > { %v1391_v38 = vpop.f32.mrf.mxu1 }
 0x2ab   : > { %v749_v45 = vadd.f32 %v1391_v38, %v1164_v6  ;;  %v965_v38 = vstv %s1487_s8 }
 0x2ac   : > { %v743_v43 = vpop.f32.mrf.mxu1 }
 0x2ad   : > { %v744_v46 = vadd.f32 %v1164_v6, %v743_v43  ;;  %v775_v48 = vmax.f32 %v749_v45, 0.0 }
 0x2af   : > { %v774_v47 = vmax.f32 %v744_v46, 0.0 }
 0x2b1   : > { %1445 = vmatprep.mubr.f32.mxu0 %v774_v47 }
 0x2b2   : > { %1446 = vmatmul.mubr.f32.gmra.mxu0 %v775_v48 }
 0x2bd   : > { %v1394_v49 = vpop.f32.mrf.mxu1 }
 0x2be   : > { %v759_v50 = vadd.f32 %v1394_v49, %v1164_v6 }
 0x2bf   : > { %v753_v51 = vpop.f32.mrf.mxu1 }
 0x2c0   : > { %v754_v52 = vadd.f32 %v1164_v6, %v753_v51  ;;  %v777_v54 = vmax.f32 %v759_v50, 0.0 }
 0x2c2   : > { %v776_v53 = vmax.f32 %v754_v52, 0.0 }
 0x2c4   : > { %1448 = vmatprep.mubr.f32.mxu0 %v776_v53 }
 0x2c5   : > { %1449 = vmatmul.mubr.f32.gmra.mxu0 %v777_v54 }
 0x31c   : > { %v1942_v57 = vpop.f32.mrf.mxu0 }
 0x31d   : > { %v872_v37 = vadd.f32 %v1942_v57, %v1165_v7 }
 0x31e   : > { %v1944_v58 = vpop.f32.mrf.mxu0 }
 0x31f   : > { %v946_v40 = vmax.f32 %v872_v37, 0.0  ;;  %v867_v41 = vadd.f32 %v1165_v7, %v1944_v58 }
 0x320   : > { %v1432_v59 = vpop.f32.mrf.mxu0 }
 0x321   : > { %v882_v33 = vadd.f32 %v1432_v59, %v1165_v7  ;;  %v945_v42 = vmax.f32 %v867_v41, 0.0 }
 0x322   : > { %v1946_v60 = vpop.f32.mrf.mxu0 }
 0x323   : > { %v948_v35 = vmax.f32 %v882_v33, 0.0  ;;  %v877_v36 = vadd.f32 %v1165_v7, %v1946_v60 }
 0x325   : > { %v947_v39 = vmax.f32 %v877_v36, 0.0 }
 0x326   : > { %v1435_v61 = vpop.f32.mrf.mxu0 }
 0x327   : > { %v892_v29 = vadd.f32 %v1435_v61, %v1165_v7 }
 0x328   : > { %v886_v62 = vpop.f32.mrf.mxu0 }
 0x329   : > { %v950_v31 = vmax.f32 %v892_v29, 0.0  ;;  %v887_v32 = vadd.f32 %v1165_v7, %v886_v62 }
 0x32b   : > { %v949_v34 = vmax.f32 %v887_v32, 0.0 }
 0x339   : > { %v1438_v63 = vpop.f32.mrf.mxu0 }
 0x33a   : > { %v902_v25 = vadd.f32 %v1438_v63, %v1165_v7 }
 0x33b   : > { %v896_v0 = vpop.f32.mrf.mxu0 }
 0x33c   : > { %v952_v27 = vmax.f32 %v902_v25, 0.0  ;;  %v897_v28 = vadd.f32 %v1165_v7, %v896_v0 }
 0x33e   : > { %v951_v30 = vmax.f32 %v897_v28, 0.0 }
 0x34c   : > { %v1441_v1 = vpop.f32.mrf.mxu0 }
 0x34d   : > { %v912_v21 = vadd.f32 %v1441_v1, %v1165_v7 }
 0x34e   : > { %v906_v2 = vpop.f32.mrf.mxu0 }
 0x34f   : > { %v954_v23 = vmax.f32 %v912_v21, 0.0  ;;  %v907_v24 = vadd.f32 %v1165_v7, %v906_v2 }
 0x351   : > { %v953_v26 = vmax.f32 %v907_v24, 0.0 }
 0x35f   : > { %v1444_v3 = vpop.f32.mrf.mxu0 }
 0x360   : > { %v922_v17 = vadd.f32 %v1444_v3, %v1165_v7 }
 0x361   : > { %v916_v4 = vpop.f32.mrf.mxu0 }
 0x362   : > { %v956_v19 = vmax.f32 %v922_v17, 0.0  ;;  %v917_v20 = vadd.f32 %v1165_v7, %v916_v4 }
 0x364   : > { %v955_v22 = vmax.f32 %v917_v20, 0.0 }
 0x372   : > { %v1447_v5 = vpop.f32.mrf.mxu0 }
 0x373   : > { %v932_v13 = vadd.f32 %v1447_v5, %v1165_v7 }
 0x374   : > { %v926_v6 = vpop.f32.mrf.mxu0 }
 0x375   : > { %v958_v15 = vmax.f32 %v932_v13, 0.0  ;;  %v927_v16 = vadd.f32 %v1165_v7, %v926_v6 }
 0x377   : > { %v957_v18 = vmax.f32 %v927_v16, 0.0 }
 0x385   : > { %v1450_v8 = vpop.f32.mrf.mxu0 }
 0x386   : > { %v942_v9 = vadd.f32 %v1450_v8, %v1165_v7 }
 0x387   : > { %v936_v10 = vpop.f32.mrf.mxu0 }
 0x388   : > { %v960_v11 = vmax.f32 %v942_v9, 0.0  ;;  %v937_v12 = vadd.f32 %v1165_v7, %v936_v10 }
 0x38a   : > { %1452 = vmatpush3.xpose.msra.mxu1 %v960_v11  ;;  %v959_v14 = vmax.f32 %v937_v12, 0.0 }
 0x38b   : > { %1453 = vmatprep.subr.mxu1 %v1673_v55 }
 0x38e   : > { %1454 = vmatpush3.xpose.msra.mxu1 %v959_v14 }
 0x38f   : > { %1455 = vmatprep.subr.mxu1 %v1673_v55 }
 0x392   : > { %1456 = vmatpush3.xpose.msra.mxu1 %v958_v15 }
 0x393   : > { %1457 = vmatprep.subr.mxu1 %v1673_v55 }
 0x396   : > { %1458 = vmatpush3.xpose.msra.mxu1 %v957_v18 }
 0x397   : > { %1459 = vmatprep.subr.mxu1 %v1673_v55 }
 0x39a   : > { %1460 = vmatpush3.xpose.msra.mxu1 %v956_v19 }
 0x39b   : > { %1461 = vmatprep.subr.mxu1 %v1673_v55 }
 0x39e   : > { %1462 = vmatpush3.xpose.msra.mxu1 %v955_v22 }
 0x39f   : > { %1463 = vmatprep.subr.mxu1 %v1673_v55 }
 0x3a2   : > { %1464 = vmatpush3.xpose.msra.mxu1 %v954_v23 }
 0x3a3   : > { %1465 = vmatprep.subr.mxu1 %v1673_v55 }
 0x3a6   : > { %1466 = vmatpush3.xpose.msra.mxu1 %v953_v26 }
 0x3a7   : > { %1467 = vmatprep.subr.mxu1 %v1673_v55 }
 0x3aa   : > { %1468 = vmatpush3.xpose.msra.mxu1 %v952_v27 }
 0x3ab   : > { %1469 = vmatprep.subr.mxu1 %v1673_v55 }
 0x3ae   : > { %1470 = vmatpush3.xpose.msra.mxu1 %v951_v30 }
 0x3af   : > { %1471 = vmatprep.subr.mxu1 %v1673_v55 }
 0x3b2   : > { %1472 = vmatpush3.xpose.msra.mxu1 %v950_v31 }
 0x3b3   : > { %1473 = vmatprep.subr.mxu1 %v1673_v55 }
 0x3b6   : > { %1474 = vmatpush3.xpose.msra.mxu1 %v949_v34 }
 0x3b7   : > { %1475 = vmatprep.subr.mxu1 %v1673_v55 }
 0x3ba   : > { %1476 = vmatpush3.xpose.msra.mxu1 %v948_v35 }
 0x3bb   : > { %1477 = vmatprep.subr.mxu1 %v1673_v55 }
 0x3be   : > { %1478 = vmatpush3.xpose.msra.mxu1 %v947_v39 }
 0x3bf   : > { %1479 = vmatprep.subr.mxu1 %v1673_v55 }
 0x3c2   : > { %1480 = vmatpush3.xpose.msra.mxu1 %v946_v40 }
 0x3c3   : > { %1481 = vmatprep.subr.mxu1 %v1673_v55 }
 0x3c6   : > { %1482 = vmatpush3.xpose.msra.mxu1 %v945_v42 }
 0x3c9   : > { %1484 = vmatmul.mubr.f32.vlgmr.msra.gmra.mxu1 %v961_v44 }
 0x489   : > { %v1033_v45 = vpop.f32.mrf.mxu1 }
 0x48a   : > { %v1034_v43 = vadd.f32 %v1033_v45, %v965_v38 }
 0x48b   : > { %v1485_v46 = vpop.f32.mrf.mxu1 }
 0x48c   : > { %1037 = vst [vmem:[%s152_s16] sm:$0xff] %v1034_v43 }
 0x48d   : > { %1613 = shalt.err (!%p1610_p0)
}
 0x48e   : > { %s1614_s28 = scalar_lea.hbm %s1971_s23, 128  ;;  %s1618_s3 = scalar_lea.hbm %s2008_s2, 256 }
 0x48f   : > { %p1615_p1 = scmp.ne.s32.totalorder %s1971_s23, %s1614_s28  ;;  %p1619_p4 = scmp.lt.s32.totalorder %s1971_s23, %s2008_s2 }
 0x490   : > { %p1620_p7 = scmp.lt.s32.totalorder %s1618_s3, %s1614_s28 }
 0x491   : > { %p1616_p2 = pnand %p1615_p1, %p1729_p5 }
 0x492   : > { %p1621_p6 = por %p1620_p7, %p1619_p4 }
 0x493   : > { %p1617_p3 = pneg %p1616_p2 }
 0x495   : > { %p1622_p8 = pnand %p1621_p6, %p1617_p3 }
 0x497   : > { %1625 = shalt.err (!%p1622_p8)
}
 0x498   : > { %1492 = dma.vmem_to_hbm [thread:$0]  (%p1729_p5), %s1053_s17, 128, %s1971_s23, %s1039_s24  }
 0x499 PF: > { %p1504_p9 = scmp.ge.s32.totalorder %s1664_s12, 2  ;;  %s1064_s6 = sand.u32 1, %s1652_s9  }
 0x49a   : > { %p2012_p10 = scmp.ne.s32.totalorder %s2010_s20, 0  ;;  %s1065_s7 = scalar_lea.sflag [#allocation4], %s1064_s6 }
 0x49c   : > { %p1499_p11 = pnand %p1504_p9, %p2012_p10 }
 0x49e   : > { %p1500_p12 = pneg %p1499_p11 }
 0x4a0   : > { %1647 = dma.done.wait (%p1500_p12), %s1065_s7, 128  }
 0x4a1   : > { %1649 = vsyncadd (%p1500_p12), %s1065_s7, 4294967168  ;;  %p13_p13 = scmp.ge.s32.totalorder %s1716_s15, 4   ;;  %s2013_s9 = smov %s1656_s10 }
 0x4a2   : > { %s2014_s10 = smov %s1660_s11  ;;  %s2015_s11 = smov %s1727_s18 }
 0x4a3   : > { %s2016_s12 = smov %s1716_s15  ;;  %15 = sbr.rel (!%p13_p13) target bundleno = 4 (0x4), region = 71 }
 0x4a8   :  { %1070 = vsyncpa [#allocation3], 1 }
 0x4a9   :  { %1072 = vsyncpa [#allocation3 + $0x1], 1 }
 0x4aa   :  { %1073 = vsyncpa [#allocation4], 1 }
 0x4ab   :  { %1075 = vsyncpa [#allocation4 + $0x1], 1 }

</bundles_post_ra>
